<compile_context>
chip_gen: v6e
topology: v6e:2x2x1
jax: 0.10.0
libtpu: 0.0.40
codegen_flags: <defaults>
</compile_context>

<pallas_src>
import functools

import jax
import jax.numpy as jnp
from jax.experimental import pallas as pl
from jax.experimental.pallas import tpu as pltpu


def encoder_kernel(x_ref, w1_ref, b1_ref, w2_ref, b2_ref, out_ref):
    # f32 -> bf16 cast on the VPU (free slot); MXU matmul with f32 accumulation.
    x_bf = x_ref[...].astype(jnp.bfloat16)
    h = jnp.dot(x_bf, w1_ref[...], preferred_element_type=jnp.float32)
    h = jnp.maximum(h + b1_ref[...], 0.0)               # bias + ReLU in f32
    # Fused mean/logvar head: (TB, 256) @ (256, 4) -> (TB, 4).
    out = jnp.dot(h.astype(jnp.bfloat16), w2_ref[...],
                  preferred_element_type=jnp.float32)
    out_ref[...] = (out + b2_ref[...]).astype(out_ref.dtype)


def _batch_tiling(B):
    """Pick (TB, padded_B).  Prefer no padding and >=2 grid steps (v7x)."""
    if B <= 256:
        return B, B                       # single full-extent tile, no pad
    for tb in (1024, 512, 256, 128):      # big tiles, multiples of 128
        if B % tb == 0 and B // tb >= 2:
            return tb, B                  # divides exactly, no pad
    if B <= 1024:
        return B, B                       # odd mid-size batch: one full tile
    tb = 256                              # ragged large batch: pad < 256 rows
    return tb, pl.cdiv(B, tb) * tb


def prepare_params(params):
    """One-time weight prep (hoisted out of the per-call path)."""
    w1, b1, wm, bm, wv, bv = params
    w2 = jnp.concatenate([wm, wv], axis=1)   # (256, 4) fused head
    b2 = jnp.concatenate([bm, bv], axis=1)   # (1, 4)
    return (w1.astype(jnp.bfloat16), b1, w2.astype(jnp.bfloat16), b2)


@functools.partial(jax.jit, static_argnames=("n_mean",))
def encoder_forward(x, w1_bf, b1, w2_bf, b2, n_mean=2):
    """x: [B, 784] float32 -> (mean [B, n_mean], logvar [B, n_mean])."""
    B, K = x.shape
    H = w1_bf.shape[1]       # 256
    O = w2_bf.shape[1]       # 4 (fused mean|logvar)

    TB, b_pad = _batch_tiling(B)
    if b_pad != B:
        x = jnp.pad(x, ((0, b_pad - B), (0, 0)))

    out = pl.pallas_call(
        encoder_kernel,
        out_shape=jax.ShapeDtypeStruct((b_pad, O), jnp.float32),
        grid=(b_pad // TB,),
        in_specs=[
            pl.BlockSpec((TB, K), lambda i: (i, 0)),   # x: f32, streamed
            pl.BlockSpec((K, H), lambda i: (0, 0)),    # w1 bf16, resident
            pl.BlockSpec((1, H), lambda i: (0, 0)),    # b1 f32, resident
            pl.BlockSpec((H, O), lambda i: (0, 0)),    # fused w2 bf16, resident
            pl.BlockSpec((1, O), lambda i: (0, 0)),    # fused b2 f32, resident
        ],
        out_specs=pl.BlockSpec((TB, O), lambda i: (i, 0)),
        compiler_params=pltpu.CompilerParams(
            dimension_semantics=("parallel",)),
    )(x, w1_bf, b1, w2_bf, b2)

    out = out[:B]
    return out[:, :n_mean], out[:, n_mean:]


def init_params(key):
    """Deterministic synthetic parameters (PyTorch Linear shapes, pre-transposed)."""
    k1, k2, k3, k4, k5, k6 = jax.random.split(key, 6)
    # fc1: Linear(784, 256)  -> W1^T : (784, 256), b1 : (1, 256)
    w1 = jax.random.normal(k1, (784, 256), jnp.float32) * 0.02
    b1 = jax.random.normal(k2, (1, 256), jnp.float32) * 0.01
    # fc2_mean: Linear(256, 2) -> Wm^T : (256, 2), bm : (1, 2)
    wm = jax.random.normal(k3, (256, 2), jnp.float32) * 0.02
    bm = jax.random.normal(k4, (1, 2), jnp.float32) * 0.01
    # fc2_logvar: Linear(256, 2) -> Wv^T : (256, 2), bv : (1, 2)
    wv = jax.random.normal(k5, (256, 2), jnp.float32) * 0.02
    bv = jax.random.normal(k6, (1, 2), jnp.float32) * 0.01
    return w1, b1, wm, bm, wv, bv


def reference_forward(x, params):
    w1, b1, wm, bm, wv, bv = params
    h = jnp.maximum(x @ w1 + b1, 0.0)
    return h @ wm + bm, h @ wv + bv


if __name__ == "__main__":
    key = jax.random.PRNGKey(0)
    kp, kx = jax.random.split(key)
    params = init_params(kp)
    prepared = prepare_params(params)     # one-time weight prep

    B = 8
    x = jax.random.normal(kx, (B, 784), jnp.float32)

    mean, logvar = jax.block_until_ready(encoder_forward(x, *prepared))

    mean_ref, logvar_ref = reference_forward(x, params)
    assert mean.shape == (B, 2) and logvar.shape == (B, 2)
    # bf16 matmul operands vs f32 reference -> loosened tolerance (accepted
    # precision trade per the performance review).
    assert jnp.allclose(mean, mean_ref, atol=5e-2, rtol=5e-2)
    assert jnp.allclose(logvar, logvar_ref, atol=5e-2, rtol=5e-2)

    print("KERNEL_OK")
</pallas_src>

<mosaic_0001>
module attributes {stable_mosaic.version = 11 : i64} {
  func.func @encoder_kernel(%arg0: i32, %arg1: memref<8x784xf32, #tpu.memory_space<vmem>>, %arg2: memref<784x256xbf16, #tpu.memory_space<vmem>>, %arg3: memref<1x256xf32, #tpu.memory_space<vmem>>, %arg4: memref<256x4xbf16, #tpu.memory_space<vmem>>, %arg5: memref<1x4xf32, #tpu.memory_space<vmem>>, %arg6: memref<8x4xf32, #tpu.memory_space<vmem>>) attributes {dimension_semantics = [#tpu.dimension_semantics<parallel>], iteration_bounds = array<i64: 1>, scalar_prefetch = 0 : i64, scratch_operands = 0 : i64, tpu.core_type = #tpu.core_type<tc>, window_params = [{transform_indices = @transform_0, window_bounds = array<i64: 8, 784>}, {pipeline_mode = #tpu.pipeline_mode<synchronous>, transform_indices = @transform_1, window_bounds = array<i64: 784, 256>}, {pipeline_mode = #tpu.pipeline_mode<synchronous>, transform_indices = @transform_2, window_bounds = array<i64: 1, 256>}, {pipeline_mode = #tpu.pipeline_mode<synchronous>, transform_indices = @transform_3, window_bounds = array<i64: 256, 4>}, {pipeline_mode = #tpu.pipeline_mode<synchronous>, transform_indices = @transform_4, window_bounds = array<i64: 1, 4>}, {transform_indices = @transform_5, window_bounds = array<i64: 8, 4>}]} {
    %c0 = arith.constant 0 : index
    %c0_0 = arith.constant 0 : index
    %0 = vector.load %arg1[%c0, %c0_0] : memref<8x784xf32, #tpu.memory_space<vmem>>, vector<8x784xf32>
    %1 = arith.truncf %0 : vector<8x784xf32> to vector<8x784xbf16>
    %c0_1 = arith.constant 0 : index
    %c0_2 = arith.constant 0 : index
    %2 = vector.load %arg2[%c0_1, %c0_2] : memref<784x256xbf16, #tpu.memory_space<vmem>>, vector<784x256xbf16>
    %cst = arith.constant dense<0.000000e+00> : vector<8x256xf32>
    %3 = tpu.matmul %1, %2, %cst {dimension_numbers = #tpu.dot_dimension_numbers<[1], [0], [0], [1], [0, 0, 1, 1], [], []>} : vector<8x784xbf16>, vector<784x256xbf16>, vector<8x256xf32> -> vector<8x256xf32>
    %c0_3 = arith.constant 0 : index
    %c0_4 = arith.constant 0 : index
    %4 = vector.load %arg3[%c0_3, %c0_4] : memref<1x256xf32, #tpu.memory_space<vmem>>, vector<1x256xf32>
    %5 = vector.broadcast %4 : vector<1x256xf32> to vector<8x256xf32>
    %6 = arith.addf %3, %5 : vector<8x256xf32>
    %cst_5 = arith.constant 0.000000e+00 : f32
    %7 = vector.broadcast %cst_5 : f32 to vector<8x256xf32>
    %8 = arith.maximumf %6, %7 : vector<8x256xf32>
    %9 = arith.truncf %8 : vector<8x256xf32> to vector<8x256xbf16>
    %c0_6 = arith.constant 0 : index
    %c0_7 = arith.constant 0 : index
    %10 = vector.load %arg4[%c0_6, %c0_7] : memref<256x4xbf16, #tpu.memory_space<vmem>>, vector<256x4xbf16>
    %cst_8 = arith.constant dense<0.000000e+00> : vector<8x4xf32>
    %11 = tpu.matmul %9, %10, %cst_8 {dimension_numbers = #tpu.dot_dimension_numbers<[1], [0], [0], [1], [0, 0, 1, 1], [], []>} : vector<8x256xbf16>, vector<256x4xbf16>, vector<8x4xf32> -> vector<8x4xf32>
    %c0_9 = arith.constant 0 : index
    %c0_10 = arith.constant 0 : index
    %12 = vector.load %arg5[%c0_9, %c0_10] : memref<1x4xf32, #tpu.memory_space<vmem>>, vector<1x4xf32>
    %13 = vector.broadcast %12 : vector<1x4xf32> to vector<8x4xf32>
    %14 = arith.addf %11, %13 : vector<8x4xf32>
    %c0_11 = arith.constant 0 : index
    %c0_12 = arith.constant 0 : index
    %15 = vector.load %arg6[%c0_11, %c0_12] : memref<8x4xf32, #tpu.memory_space<vmem>>, vector<8x4xf32>
    tpu.vector_store %arg6[%c0_11, %c0_12], %14 {strides = array<i32>} : memref<8x4xf32, #tpu.memory_space<vmem>>, vector<8x4xf32>,
    return
  }
  func.func @transform_0(%arg0: i32) -> (i32, i32) {
    %c0_i32 = arith.constant 0 : i32
    %c0_i32_0 = arith.constant 0 : i32
    return %arg0, %c0_i32 : i32, i32
  }
  func.func @transform_1(%arg0: i32) -> (i32, i32) {
    %c0_i32 = arith.constant 0 : i32
    %c0_i32_0 = arith.constant 0 : i32
    %c0_i32_1 = arith.constant 0 : i32
    return %c0_i32, %c0_i32_0 : i32, i32
  }
  func.func @transform_2(%arg0: i32) -> (i32, i32) {
    %c0_i32 = arith.constant 0 : i32
    %c0_i32_0 = arith.constant 0 : i32
    %c0_i32_1 = arith.constant 0 : i32
    return %c0_i32, %c0_i32_0 : i32, i32
  }
  func.func @transform_3(%arg0: i32) -> (i32, i32) {
    %c0_i32 = arith.constant 0 : i32
    %c0_i32_0 = arith.constant 0 : i32
    %c0_i32_1 = arith.constant 0 : i32
    return %c0_i32, %c0_i32_0 : i32, i32
  }
  func.func @transform_4(%arg0: i32) -> (i32, i32) {
    %c0_i32 = arith.constant 0 : i32
    %c0_i32_0 = arith.constant 0 : i32
    %c0_i32_1 = arith.constant 0 : i32
    return %c0_i32, %c0_i32_0 : i32, i32
  }
  func.func @transform_5(%arg0: i32) -> (i32, i32) {
    %c0_i32 = arith.constant 0 : i32
    %c0_i32_0 = arith.constant 0 : i32
    return %arg0, %c0_i32 : i32, i32
  }
}

</mosaic_0001>

<bundles_post_ra>
// kernel: encoder_forward.1
= control target key start
LH: loop header
LB: loop body
LE: loop exit
PB: predicated region body
PF: predicated region fallthrough
CT: control target
= control target key end

     0   :  { %10 = vsyncpa [#allocation3], 0  ;;  %s1330_s18 = smov [#allocation2]   ;;  %s1446_s0 = inlined_call_operand.vmem [shape: f32[8,784], index: 0, kind: input, shape index: {}]   ;;  %s1447_s1 = inlined_call_operand.hbm [shape: bf16[784,256], index: 1, kind: input, shape index: {}]   ;;  %s1448_s2 = inlined_call_operand.vmem [shape: f32[1,256], index: 2, kind: input, shape index: {}]   ;;  %s1449_s3 = inlined_call_operand.vmem [shape: bf16[256,4], index: 3, kind: input, shape index: {}]   ;;  %s1450_s4 = inlined_call_operand.vmem [shape: f32[1,4], index: 4, kind: input, shape index: {}]   ;;  %s1451_s5 = inlined_call_operand.vmem [shape: f32[8,4], index: 5, kind: output, shape index: {}]  }
   0x1   :  { %s18_s19 = sshll.u32 %s1330_s18, 4  ;;  %s19_s19 = int_to_ptr.vmem [resolvable:$true] %s18_s19 }
   0x2   :  { %s1316_s20 = scalar_lea.vmem %s19_s19, 12544  ;;  %p1321_p1 = scmp.lt.s32.totalorder %s19_s19, %s19_s19 }
   0x3   :  { %p1317_p0 = scmp.ne.s32.totalorder %s19_s19, %s1316_s20  ;;  %p1322_p2 = scmp.lt.s32.totalorder %s1316_s20, %s1316_s20 }
   0x5   :  { %p1323_p3 = por %p1322_p2, %p1321_p1 }
   0x7   :  { %p1324_p4 = pnand %p1323_p3, %p1317_p0 }
   0x9   :  { %1327 = shalt.err (!%p1324_p4)
}
   0xa   :  { %s1331_s21 = smov 128   ;;  %s1332_s22 = smov 8  }
   0xb   :  { %24 = dma.hbm_to_vmem [thread:$0]  %s1447_s1, 12544, %s19_s19, [#allocation3], %s1331_s21, %s1331_s21, %s1332_s22  }
   0xc   :  { %1328 = dma.done.wait [#allocation3], 12544  }
   0xd   :  { %1329 = vsyncadd [#allocation3], 4294954752  ;;  %v1145_v0 = vld [vmem:[#allocation2 + $0x74] ss:$8 sps:$4 sm:$0xff]   ;;  %v1147_v1 = vld [vmem:[#allocation2 + $0x70] ss:$8 sps:$4 sm:$0xff]  }
   0xe   :  { %653 = vmatprep.subr.bf16.mxu0 %v1145_v0  ;;  %v1148_v2 = vld [vmem:[#allocation2 + $0x174] ss:$8 sps:$4 sm:$0xff]   ;;  %v1150_v3 = vld [vmem:[#allocation2 + $0x170] ss:$8 sps:$4 sm:$0xff]   ;;  %v1151_v4 = vld [vmem:[#allocation2 + $0x64] ss:$8 sps:$4 sm:$0xff]  }
   0xf   :  { %654 = vmatpush1.bf16.msra.mxu0 %v1147_v1  ;;  %v1153_v5 = vld [vmem:[#allocation2 + $0x60] ss:$8 sps:$4 sm:$0xff]   ;;  %694 = vmatprep.subr.bf16.mxu1 %v1148_v2  ;;  %v1154_v6 = vld [vmem:[#allocation2 + $0x164] ss:$8 sps:$4 sm:$0xff]   ;;  %v1157_v8 = vld [vmem:[#allocation2 + $0x54] ss:$8 sps:$4 sm:$0xff]  }
  0x10   :  { %695 = vmatpush1.bf16.msra.mxu1 %v1150_v3  ;;  %655 = vmatprep.subr.bf16.mxu0 %v1151_v4  ;;  %v1156_v7 = vld [vmem:[#allocation2 + $0x160] ss:$8 sps:$4 sm:$0xff]   ;;  %v1159_v9 = vld [vmem:[#allocation2 + $0x50] ss:$8 sps:$4 sm:$0xff]   ;;  %v1160_v10 = vld [vmem:[#allocation2 + $0x154] ss:$8 sps:$4 sm:$0xff]  }
  0x11   :  { %696 = vmatprep.subr.bf16.mxu1 %v1154_v6  ;;  %v1163_v11 = vld [vmem:[#allocation2 + $0x44] ss:$8 sps:$4 sm:$0xff]   ;;  %v1162_v12 = vld [vmem:[#allocation2 + $0x150] ss:$8 sps:$4 sm:$0xff]   ;;  %v1165_v14 = vld [vmem:[#allocation2 + $0x40] ss:$8 sps:$4 sm:$0xff]  }
  0x12   :  { %v1166_v13 = vld [vmem:[#allocation2 + $0x144] ss:$8 sps:$4 sm:$0xff]   ;;  %v1169_v15 = vld [vmem:[#allocation2 + $0x34] ss:$8 sps:$4 sm:$0xff]   ;;  %v1168_v16 = vld [vmem:[#allocation2 + $0x140] ss:$8 sps:$4 sm:$0xff]  }
  0x13   :  { %656 = vmatpush1.bf16.msra.mxu0 %v1153_v5  ;;  %v1172_v17 = vld [vmem:[#allocation2 + $0x134] ss:$8 sps:$4 sm:$0xff]   ;;  %v1171_v18 = vld [vmem:[#allocation2 + $0x30] ss:$8 sps:$4 sm:$0xff]   ;;  %v1175_v19 = vld [vmem:[#allocation2 + $0x24] ss:$8 sps:$4 sm:$0xff]  }
  0x14   :  { %657 = vmatprep.subr.bf16.mxu0 %v1157_v8  ;;  %697 = vmatpush1.bf16.msra.mxu1 %v1156_v7  ;;  %v1174_v20 = vld [vmem:[#allocation2 + $0x130] ss:$8 sps:$4 sm:$0xff]   ;;  %v1178_v21 = vld [vmem:[#allocation2 + $0x124] ss:$8 sps:$4 sm:$0xff]   ;;  %v1177_v22 = vld [vmem:[#allocation2 + $0x20] ss:$8 sps:$4 sm:$0xff]  }
  0x15   :  { %698 = vmatprep.subr.bf16.mxu1 %v1160_v10  ;;  %v1181_v23 = vld [vmem:[#allocation2 + $0x14] ss:$8 sps:$4 sm:$0xff]   ;;  %v1180_v24 = vld [vmem:[#allocation2 + $0x120] ss:$8 sps:$4 sm:$0xff]   ;;  %v1183_v26 = vld [vmem:[#allocation2 + $0x10] ss:$8 sps:$4 sm:$0xff]  }
  0x16   :  { %v1184_v25 = vld [vmem:[#allocation2 + $0x114] ss:$8 sps:$4 sm:$0xff]   ;;  %v1187_v27 = vld [vmem:[#allocation2 + $0x4] ss:$8 sps:$4 sm:$0xff]   ;;  %v1186_v28 = vld [vmem:[#allocation2 + $0x110] ss:$8 sps:$4 sm:$0xff]  }
  0x17   :  { %658 = vmatpush1.bf16.msra.mxu0 %v1159_v9  ;;  %v1190_v29 = vld [vmem:[#allocation2 + $0x104] ss:$8 sps:$4 sm:$0xff]   ;;  %v1189_v30 = vld [vmem:[#allocation2] ss:$8 sps:$4 sm:$0xff]   ;;  %v1193_v31 = vld [vmem:[#allocation2 + $0xf4] ss:$8 sps:$4 sm:$0xff]  }
  0x18   :  { %659 = vmatprep.subr.bf16.mxu0 %v1163_v11  ;;  %699 = vmatpush1.bf16.msra.mxu1 %v1162_v12  ;;  %v1192_v32 = vld [vmem:[#allocation2 + $0x100] ss:$8 sps:$4 sm:$0xff]   ;;  %v1196_v33 = vld [vmem:[#allocation2 + $0x1f4] ss:$8 sps:$4 sm:$0xff]   ;;  %v1195_v34 = vld [vmem:[#allocation2 + $0xf0] ss:$8 sps:$4 sm:$0xff]  }
  0x19   :  { %700 = vmatprep.subr.bf16.mxu1 %v1166_v13  ;;  %v1199_v35 = vld [vmem:[#allocation2 + $0xe4] ss:$8 sps:$4 sm:$0xff]   ;;  %v1198_v36 = vld [vmem:[#allocation2 + $0x1f0] ss:$8 sps:$4 sm:$0xff]   ;;  %v1201_v38 = vld [vmem:[#allocation2 + $0xe0] ss:$8 sps:$4 sm:$0xff]  }
  0x1a   :  { %v1202_v37 = vld [vmem:[#allocation2 + $0x1e4] ss:$8 sps:$4 sm:$0xff]   ;;  %v1205_v39 = vld [vmem:[#allocation2 + $0xd4] ss:$8 sps:$4 sm:$0xff]   ;;  %v1204_v40 = vld [vmem:[#allocation2 + $0x1e0] ss:$8 sps:$4 sm:$0xff]  }
  0x1b   :  { %660 = vmatpush1.bf16.msra.mxu0 %v1165_v14  ;;  %v1208_v41 = vld [vmem:[#allocation2 + $0x1d4] ss:$8 sps:$4 sm:$0xff]   ;;  %v1207_v42 = vld [vmem:[#allocation2 + $0xd0] ss:$8 sps:$4 sm:$0xff]   ;;  %v1211_v43 = vld [vmem:[#allocation2 + $0xc4] ss:$8 sps:$4 sm:$0xff]  }
  0x1c   :  { %661 = vmatprep.subr.bf16.mxu0 %v1169_v15  ;;  %701 = vmatpush1.bf16.msra.mxu1 %v1168_v16  ;;  %v1210_v44 = vld [vmem:[#allocation2 + $0x1d0] ss:$8 sps:$4 sm:$0xff]   ;;  %v1214_v45 = vld [vmem:[#allocation2 + $0x1c4] ss:$8 sps:$4 sm:$0xff]   ;;  %v1213_v47 = vld [vmem:[#allocation2 + $0xc0] ss:$8 sps:$4 sm:$0xff]  }
  0x1d   :  { %702 = vmatprep.subr.bf16.mxu1 %v1172_v17  ;;  %v36_v46 = vld [vmem:[%s1446_s0 + $0x8] sm:$0xff]  ;;  %v1217_v49 = vld [vmem:[#allocation2 + $0xb4] ss:$8 sps:$4 sm:$0xff]   ;;  %v1219_v54 = vld [vmem:[#allocation2 + $0xb0] ss:$8 sps:$4 sm:$0xff]   ;;  %vm649_vm0 = vcmask 130048  }
  0x1e   :  { %v43_v48 = vpack.c.bf16 %v36_v46, %v36_v46  ;;  %v38_v50 = vld [vmem:[%s1446_s0 + $0x18] sm:$0xff]  ;;  %v1216_v51 = vld [vmem:[#allocation2 + $0x1c0] ss:$8 sps:$4 sm:$0xff]   ;;  %v1223_v55 = vld [vmem:[#allocation2 + $0xa4] ss:$8 sps:$4 sm:$0xff]   ;;  %vm996_vm1 = vcmask 31744  }
  0x1f   :  { %662 = vmatpush1.bf16.msra.mxu0 %v1171_v18  ;;  %v45_v52 = vpack.c.bf16 %v38_v50, %v38_v50  ;;  %v1220_v53 = vld [vmem:[#allocation2 + $0x1b4] ss:$8 sps:$4 sm:$0xff]   ;;  %v1222_v56 = vld [vmem:[#allocation2 + $0x1b0] ss:$8 sps:$4 sm:$0xff]   ;;  %v1226_v57 = vld [vmem:[#allocation2 + $0x1a4] ss:$8 sps:$4 sm:$0xff]  }
  0x20   :  { %663 = vmatprep.subr.bf16.mxu0 %v1175_v19  ;;  %703 = vmatpush1.bf16.msra.mxu1 %v1174_v20  ;;  %v1225_v58 = vld [vmem:[#allocation2 + $0xa0] ss:$8 sps:$4 sm:$0xff]   ;;  %v1229_v59 = vld [vmem:[#allocation2 + $0x94] ss:$8 sps:$4 sm:$0xff]   ;;  %v1231_v62 = vld [vmem:[#allocation2 + $0x90] ss:$8 sps:$4 sm:$0xff]  }
  0x21   :  { %704 = vmatprep.subr.bf16.mxu1 %v1178_v21  ;;  %685 = vmatprep.mubr.bf16.mxu0 %v43_v48  ;;  %v1228_v60 = vld [vmem:[#allocation2 + $0x1a0] ss:$8 sps:$4 sm:$0xff]   ;;  %v1232_v61 = vld [vmem:[#allocation2 + $0x194] ss:$8 sps:$4 sm:$0xff]   ;;  %v1235_v63 = vld [vmem:[#allocation2 + $0x84] ss:$8 sps:$4 sm:$0xff]  }
  0x22   :  { %726 = vmatprep.mubr.bf16.mxu1 %v45_v52  ;;  %v1234_v0 = vld [vmem:[#allocation2 + $0x190] ss:$8 sps:$4 sm:$0xff]   ;;  %v1237_v1 = vld [vmem:[#allocation2 + $0x80] ss:$8 sps:$4 sm:$0xff]   ;;  %v1238_v2 = vld [vmem:[#allocation2 + $0x184] ss:$8 sps:$4 sm:$0xff]  }
  0x23   :  { %664 = vmatpush1.bf16.msra.mxu0 %v1177_v22  ;;  %v1240_v3 = vld [vmem:[#allocation2 + $0x180] ss:$8 sps:$4 sm:$0xff]   ;;  %v1243_v5 = vld [vmem:[#allocation2 + $0x274] ss:$8 sps:$4 sm:$0xff]   ;;  %v1241_v8 = vld [vmem:[#allocation2 + $0x270] ss:$8 sps:$4 sm:$0xff]  }
  0x24   :  { %665 = vmatprep.subr.bf16.mxu0 %v1181_v23  ;;  %705 = vmatpush1.bf16.msra.mxu1 %v1180_v24  ;;  %v35_v4 = vld [vmem:[%s1446_s0] sm:$0xff]  ;;  %v37_v6 = vld [vmem:[%s1446_s0 + $0x10] sm:$0xff]  ;;  %v40_v16 = vld [vmem:[%s1446_s0 + $0x28] sm:$0xff]  ;;  %v1333_v19 = vmov 0  }
  0x25   :  { %706 = vmatprep.subr.bf16.mxu1 %v1184_v25  ;;  %v42_v7 = vpack.c.bf16 %v35_v4, %v35_v4  ;;  %v1246_v9 = vld [vmem:[#allocation2 + $0x264] ss:$8 sps:$4 sm:$0xff]   ;;  %v44_v10 = vpack.c.bf16 %v37_v6, %v37_v6  ;;  %v1286_v11 = vld [vmem:[#allocation2 + $0x300] ss:$8 sps:$4 sm:$0xff]   ;;  %v1249_v14 = vld [vmem:[#allocation2 + $0x254] ss:$8 sps:$4 sm:$0xff]   ;;  %v47_v17 = vpack.c.bf16 %v40_v16, %v40_v16 }
  0x26   :  { %v1288_v12 = vld [vmem:[#allocation2 + $0x304] ss:$8 sps:$4 sm:$0xff]   ;;  %v1244_v13 = vld [vmem:[#allocation2 + $0x260] ss:$8 sps:$4 sm:$0xff]   ;;  %v41_v15 = vld [vmem:[%s1446_s0 + $0x30] sm:$0xff] }
  0x27   :  { %666 = vmatpush1.bf16.msra.mxu0 %v1183_v26  ;;  %v1247_v18 = vld [vmem:[#allocation2 + $0x250] ss:$8 sps:$4 sm:$0xff]   ;;  %v1252_v20 = vld [vmem:[#allocation2 + $0x244] ss:$8 sps:$4 sm:$0xff]   ;;  %v48_v21 = vpack.c.bf16 %v41_v15, %v41_v15  ;;  %v1250_v22 = vld [vmem:[#allocation2 + $0x240] ss:$8 sps:$4 sm:$0xff]  }
  0x28   :  { %667 = vmatprep.subr.bf16.mxu0 %v1187_v27  ;;  %707 = vmatpush1.bf16.msra.mxu1 %v1186_v28  ;;  %v1255_v23 = vld [vmem:[#allocation2 + $0x234] ss:$8 sps:$4 sm:$0xff]   ;;  %v1253_v24 = vld [vmem:[#allocation2 + $0x230] ss:$8 sps:$4 sm:$0xff]   ;;  %v1258_v25 = vld [vmem:[#allocation2 + $0x224] ss:$8 sps:$4 sm:$0xff]  }
  0x29   :  { %708 = vmatprep.subr.bf16.mxu1 %v1190_v29  ;;  %v1256_v26 = vld [vmem:[#allocation2 + $0x220] ss:$8 sps:$4 sm:$0xff]   ;;  %v1261_v27 = vld [vmem:[#allocation2 + $0x214] ss:$8 sps:$4 sm:$0xff]   ;;  %v1259_v28 = vld [vmem:[#allocation2 + $0x210] ss:$8 sps:$4 sm:$0xff]  }
  0x2a   :  { %v1264_v29 = vld [vmem:[#allocation2 + $0x204] ss:$8 sps:$4 sm:$0xff]   ;;  %v1289_v46 = vld [vmem:[#allocation2 + $0x280] ss:$8 sps:$4 sm:$0xff]   ;;  %v1293_v50 = vld [vmem:[%s1449_s3 + $0x38] sm:$0xff]  }
  0x2b   :  { %668 = vmatpush1.bf16.msra.mxu0 %v1189_v30  ;;  %v1262_v30 = vld [vmem:[#allocation2 + $0x200] ss:$8 sps:$4 sm:$0xff]   ;;  %v1295_v52 = vld [vmem:[%s1449_s3 + $0x30] sm:$0xff]  }
  0x2c   :  { %669 = vmatprep.subr.bf16.mxu0 %v1193_v31  ;;  %709 = vmatpush1.bf16.msra.mxu1 %v1192_v32  ;;  %v1267_v31 = vld [vmem:[#allocation2 + $0x2f4] ss:$8 sps:$4 sm:$0xff]   ;;  %v1265_v32 = vld [vmem:[#allocation2 + $0x2f0] ss:$8 sps:$4 sm:$0xff]   ;;  %v147_v16 = vld [vmem:[%s1448_s2] sm:$0x3] }
  0x2d   :  { %710 = vmatprep.subr.bf16.mxu1 %v1196_v33  ;;  %v1270_v33 = vld [vmem:[#allocation2 + $0x2e4] ss:$8 sps:$4 sm:$0xff]  }
  0x2f   :  { %670 = vmatpush2.bf16.msra.mxu0 %v1195_v34  ;;  %v1268_v34 = vld [vmem:[#allocation2 + $0x2e0] ss:$8 sps:$4 sm:$0xff]  }
  0x30   :  { %671 = vmatprep.subr.bf16.mxu0 %v1199_v35  ;;  %711 = vmatpush2.bf16.msra.mxu1 %v1198_v36  ;;  %v1273_v35 = vld [vmem:[#allocation2 + $0x2d4] ss:$8 sps:$4 sm:$0xff]   ;;  %v1271_v36 = vld [vmem:[#allocation2 + $0x2d0] ss:$8 sps:$4 sm:$0xff]  }
  0x31   :  { %712 = vmatprep.subr.bf16.mxu1 %v1202_v37  ;;  %v1276_v37 = vld [vmem:[#allocation2 + $0x2c4] ss:$8 sps:$4 sm:$0xff]  }
  0x33   :  { %672 = vmatpush2.bf16.msra.mxu0 %v1201_v38  ;;  %v1274_v38 = vld [vmem:[#allocation2 + $0x2c0] ss:$8 sps:$4 sm:$0xff]  }
  0x34   :  { %673 = vmatprep.subr.bf16.mxu0 %v1205_v39  ;;  %713 = vmatpush2.bf16.msra.mxu1 %v1204_v40  ;;  %v1279_v39 = vld [vmem:[#allocation2 + $0x2b4] ss:$8 sps:$4 sm:$0xff]   ;;  %v1277_v40 = vld [vmem:[#allocation2 + $0x2b0] ss:$8 sps:$4 sm:$0xff]  }
  0x35   :  { %714 = vmatprep.subr.bf16.mxu1 %v1208_v41  ;;  %v1282_v41 = vld [vmem:[#allocation2 + $0x2a4] ss:$8 sps:$4 sm:$0xff]  }
  0x37   :  { %674 = vmatpush2.bf16.msra.mxu0 %v1207_v42  ;;  %v1280_v42 = vld [vmem:[#allocation2 + $0x2a0] ss:$8 sps:$4 sm:$0xff]  }
  0x38   :  { %675 = vmatprep.subr.bf16.mxu0 %v1211_v43  ;;  %715 = vmatpush2.bf16.msra.mxu1 %v1210_v44  ;;  %v1285_v43 = vld [vmem:[#allocation2 + $0x294] ss:$8 sps:$4 sm:$0xff]   ;;  %v1283_v44 = vld [vmem:[#allocation2 + $0x290] ss:$8 sps:$4 sm:$0xff]  }
  0x39   :  { %716 = vmatprep.subr.bf16.mxu1 %v1214_v45  ;;  %v1291_v45 = vld [vmem:[#allocation2 + $0x284] ss:$8 sps:$4 sm:$0xff]  }
  0x3b   :  { %676 = vmatpush2.bf16.msra.mxu0 %v1213_v47  ;;  %v39_v47 = vld [vmem:[%s1446_s0 + $0x20] sm:$0xff] }
  0x3c   :  { %677 = vmatprep.subr.bf16.mxu0 %v1217_v49  ;;  %717 = vmatpush2.bf16.msra.mxu1 %v1216_v51  ;;  %v46_v48 = vpack.c.bf16 %v39_v47, %v39_v47  ;;  %v1292_v49 = vld [vmem:[%s1449_s3 + $0x78] sm:$0xff]   ;;  %v1294_v51 = vld [vmem:[%s1449_s3 + $0x70] sm:$0xff]  }
  0x3d   :  { %718 = vmatprep.subr.bf16.mxu1 %v1220_v53  ;;  %v1296_v53 = vld [vmem:[%s1449_s3 + $0x68] sm:$0xff]  }
  0x3f   :  { %678 = vmatpush2.bf16.msra.mxu0 %v1219_v54  ;;  %v1297_v54 = vld [vmem:[%s1449_s3 + $0x28] sm:$0xff]  }
  0x40   :  { %679 = vmatprep.subr.bf16.mxu0 %v1223_v55  ;;  %719 = vmatpush2.bf16.msra.mxu1 %v1222_v56  ;;  %v1298_v55 = vld [vmem:[%s1449_s3 + $0x60] sm:$0xff]  }
  0x41   :  { %720 = vmatprep.subr.bf16.mxu1 %v1226_v57  ;;  %v1299_v56 = vld [vmem:[%s1449_s3 + $0x20] sm:$0xff]   ;;  %v1300_v57 = vld [vmem:[%s1449_s3 + $0x58] sm:$0xff]  }
  0x43   :  { %680 = vmatpush2.bf16.msra.mxu0 %v1225_v58  ;;  %v1301_v58 = vld [vmem:[%s1449_s3 + $0x18] sm:$0xff]  }
  0x44   :  { %681 = vmatprep.subr.bf16.mxu0 %v1229_v59  ;;  %721 = vmatpush2.bf16.msra.mxu1 %v1228_v60  ;;  %v1302_v59 = vld [vmem:[%s1449_s3 + $0x50] sm:$0xff]  }
  0x45   :  { %722 = vmatprep.subr.bf16.mxu1 %v1232_v61  ;;  %v1303_v60 = vld [vmem:[%s1449_s3 + $0x10] sm:$0xff]   ;;  %v1304_v61 = vld [vmem:[%s1449_s3 + $0x48] sm:$0xff]  }
  0x47   :  { %682 = vmatpush2.bf16.msra.mxu0 %v1231_v62  ;;  %v1305_v62 = vld [vmem:[%s1449_s3 + $0x8] sm:$0xff]  }
  0x48   :  { %683 = vmatprep.subr.bf16.mxu0 %v1235_v63  ;;  %723 = vmatpush2.bf16.msra.mxu1 %v1234_v0  ;;  %v1306_v63 = vld [vmem:[%s1449_s3 + $0x40] sm:$0xff]  }
  0x49   :  { %724 = vmatprep.subr.bf16.mxu1 %v1238_v2  ;;  %v1307_v0 = vld [vmem:[%s1449_s3] sm:$0xff]  }
  0x4b   :  { %684 = vmatpush2.bf16.msra.mxu0 %v1237_v1 }
  0x4c   :  { %735 = vmatprep.subr.bf16.mxu0 %v1243_v5  ;;  %725 = vmatpush2.bf16.msra.mxu1 %v1240_v3 }
  0x4d   :  { %790 = vmatprep.subr.bf16.mxu1 %v1288_v12 }
  0x4e   :  { %686 = vmatmul.mubr.bf16.vlgmr.msra.gmra.mxu0 %v42_v7 }
  0x4f   :  { %736 = vmatpush1.bf16.msra.mxu0 %v1241_v8  ;;  %727 = vmatmul.mubr.bf16.vlgmr.msra.gmra.mxu1 %v44_v10 }
  0x50   :  { %737 = vmatprep.subr.bf16.mxu0 %v1246_v9  ;;  %791 = vmatpush1.bf16.msra.mxu1 %v1286_v11 }
  0x51   :  { %808 = vmatprep.mubr.bf16.mxu1 %v1333_v19  ;;  %767 = vmatprep.mubr.bf16.mxu0 %v47_v17 }
  0x52   :  { %1119 = vmatprep.subr.bf16.mxu1 %v1292_v49 }
  0x53   :  { %738 = vmatpush1.bf16.msra.mxu0 %v1244_v13  ;;  %v149_v13 = vlaneseq }
  0x54   :  { %739 = vmatprep.subr.bf16.mxu0 %v1249_v14 }
  0x55   :  { %v150_v14 = vshrl.u32 %v149_v13, 7 }
  0x57   :  { %740 = vmatpush1.bf16.msra.mxu0 %v1247_v18  ;;  %1101 = vmatmul.mubr.msk.bf16.vlgmr.msra.gmra.mxu1 %vm649_vm0, %v48_v21  ;;  %v151_v15 = vsub.s32 0, %v150_v14  ;;  %v155_v17 = vsub.s32 1, %v150_v14 }
  0x58   :  { %741 = vmatprep.subr.bf16.mxu0 %v1252_v20  ;;  %1120 = vmatpush3.bf16.msra.mxu1 %v1293_v50 }
  0x59   :  { %1121 = vmatprep.subr.bf16.mxu1 %v1294_v51  ;;  %v152_v18 = vrot.slane %v147_v16, %v151_v15  ;;  %v156_v19 = vrot.slane %v147_v16, %v155_v17 }
  0x5b   :  { %742 = vmatpush1.bf16.msra.mxu0 %v1250_v22 }
  0x5c   :  { %743 = vmatprep.subr.bf16.mxu0 %v1255_v23  ;;  %1122 = vmatpush3.bf16.msra.mxu1 %v1295_v52 }
  0x5d   :  { %1123 = vmatprep.subr.bf16.mxu1 %v1296_v53 }
  0x5f   :  { %744 = vmatpush1.bf16.msra.mxu0 %v1253_v24 }
  0x60   :  { %745 = vmatprep.subr.bf16.mxu0 %v1258_v25  ;;  %1124 = vmatpush3.bf16.msra.mxu1 %v1297_v54 }
  0x61   :  { %1125 = vmatprep.subr.bf16.mxu1 %v1298_v55 }
  0x63   :  { %746 = vmatpush1.bf16.msra.mxu0 %v1256_v26 }
  0x64   :  { %747 = vmatprep.subr.bf16.mxu0 %v1261_v27  ;;  %1126 = vmatpush3.bf16.msra.mxu1 %v1299_v56 }
  0x65   :  { %1127 = vmatprep.subr.bf16.mxu1 %v1300_v57 }
  0x67   :  { %748 = vmatpush1.bf16.msra.mxu0 %v1259_v28 }
  0x68   :  { %749 = vmatprep.subr.bf16.mxu0 %v1264_v29  ;;  %1128 = vmatpush3.bf16.msra.mxu1 %v1301_v58 }
  0x69   :  { %1129 = vmatprep.subr.bf16.mxu1 %v1302_v59 }
  0x6b   :  { %750 = vmatpush1.bf16.msra.mxu0 %v1262_v30 }
  0x6c   :  { %751 = vmatprep.subr.bf16.mxu0 %v1267_v31  ;;  %1130 = vmatpush3.bf16.msra.mxu1 %v1303_v60 }
  0x6d   :  { %1131 = vmatprep.subr.bf16.mxu1 %v1304_v61 }
  0x6f   :  { %752 = vmatpush2.bf16.msra.mxu0 %v1265_v32 }
  0x70   :  { %753 = vmatprep.subr.bf16.mxu0 %v1270_v33  ;;  %1132 = vmatpush3.bf16.msra.mxu1 %v1305_v62 }
  0x71   :  { %1133 = vmatprep.subr.bf16.mxu1 %v1306_v63 }
  0x73   :  { %754 = vmatpush2.bf16.msra.mxu0 %v1268_v34 }
  0x74   :  { %755 = vmatprep.subr.bf16.mxu0 %v1273_v35  ;;  %1134 = vmatpush3.bf16.msra.mxu1 %v1307_v0 }
  0x77   :  { %756 = vmatpush2.bf16.msra.mxu0 %v1271_v36 }
  0x78   :  { %757 = vmatprep.subr.bf16.mxu0 %v1276_v37  ;;  %v1102_v37 = vld [vmem:[%s1450_s4] ss:$0 sm:$0xff] }
  0x7b   :  { %758 = vmatpush2.bf16.msra.mxu0 %v1274_v38 }
  0x7c   :  { %759 = vmatprep.subr.bf16.mxu0 %v1279_v39 }
  0x7f   :  { %760 = vmatpush2.bf16.msra.mxu0 %v1277_v40 }
  0x80   :  { %761 = vmatprep.subr.bf16.mxu0 %v1282_v41 }
  0x83   :  { %762 = vmatpush2.bf16.msra.mxu0 %v1280_v42 }
  0x84   :  { %763 = vmatprep.subr.bf16.mxu0 %v1285_v43 }
  0x87   :  { %764 = vmatpush2.bf16.msra.mxu0 %v1283_v44 }
  0x88   :  { %765 = vmatprep.subr.bf16.mxu0 %v1291_v45 }
  0x8b   :  { %766 = vmatpush2.bf16.msra.mxu0 %v1289_v46 }
  0x8e   :  { %768 = vmatmul.mubr.bf16.vlgmr.msra.gmra.mxu0 %v46_v48 }
 0x10e   :  { %v687_v1 = vpop.f32.mrf.mxu0 }
 0x10f   :  { %v728_v3 = vpop.f32.mrf.mxu1  ;;  %v688_v20 = vadd.f32 %v687_v1, %v152_v18 }
 0x110   :  { %v689_v2 = vpop.f32.mrf.mxu0 }
 0x111   :  { %v730_v5 = vpop.f32.mrf.mxu1  ;;  %v690_v21 = vadd.f32 %v689_v2, %v156_v19  ;;  %v729_v22 = vadd.f32 %v728_v3, %v688_v20 }
 0x112   :  { %v691_v4 = vpop.f32.mrf.mxu0 }
 0x113   :  { %v732_v7 = vpop.f32.mrf.mxu1  ;;  %v731_v24 = vadd.f32 %v730_v5, %v690_v21 }
 0x114   :  { %v692_v6 = vpop.f32.mrf.mxu0 }
 0x115   :  { %v733_v8 = vpop.f32.mrf.mxu1 }
 0x117   :  { %v810_v9 = vpop.f32.mrf.mxu1 }
 0x119   :  { %v812_v10 = vpop.f32.mrf.mxu1 }
 0x11b   :  { %v814_v11 = vpop.f32.mrf.mxu1 }
 0x11d   :  { %v815_v12 = vpop.f32.mrf.mxu1 }
 0x14e   :  { %v769_v23 = vpop.f32.mrf.mxu0 }
 0x14f   :  { %v770_v25 = vadd.f32 %v769_v23, %v729_v22 }
 0x150   :  { %v771_v26 = vpop.f32.mrf.mxu0 }
 0x151   :  { %v811_v27 = vadd.f32 %v810_v9, %v770_v25  ;;  %v772_v28 = vadd.f32 %v771_v26, %v731_v24 }
 0x152   :  { %v773_v29 = vpop.f32.mrf.mxu0 }
 0x153   :  { %v813_v30 = vadd.f32 %v812_v10, %v772_v28  ;;  %v817_v31 = vmax.f32 %v811_v27, 0.0 }
 0x154   :  { %v774_v32 = vpop.f32.mrf.mxu0 }
 0x155   :  { %v818_v33 = vmax.f32 %v813_v30, 0.0  ;;  %v819_v35 = vpack.c.bf16 %v817_v31, %v817_v31 }
 0x157   :  { %v820_v34 = vpack.c.bf16 %v818_v33, %v818_v33 }
 0x159   :  { %988 = vmatprep.mubr.bf16.mxu1 %v820_v34 }
 0x15a   :  { %989 = vmatmul.mubr.bf16.vlgmr.msra.gmra.mxu1 %v819_v35 }
 0x21a   :  { %v1135_v36 = vpop.f32.mrf.mxu1 }
 0x21c   :  { %v1136_v38 = vpop.f32.mrf.mxu1 }
 0x21d   :  { %v1137_v39 = vadd.f32 %v1136_v38, %v1135_v36 }
 0x21e   :  { %v1138_v40 = vpop.f32.mrf.mxu1 }
 0x21f   :  { %v991_v41 = vadd.f32 %v1137_v39, %v1102_v37 }
 0x220   :  { %v1139_v42 = vpop.f32.mrf.mxu1 }
 0x221   :  { %997 = vst.msk [vmem:[%s1451_s5] sm:$0xff] %vm996_vm1, %v991_v41 }
 0x222   :  { %1002 = vsyncpa [#allocation3], 1 }

</bundles_post_ra>
